<compile_context>
chip_gen: v7x
topology: tpu7x:2x2x1
jax: 0.10.0
libtpu: 0.0.40
codegen_flags: <defaults>
</compile_context>

<pallas_src>
import functools

import jax
import jax.numpy as jnp
from jax.experimental import pallas as pl
from jax.experimental.pallas import tpu as pltpu

ACT_DTYPE = jnp.bfloat16          # inter-layer activation dtype (MXU-native, halves HBM traffic)
_VMEM_LIMIT = 32 * 1024 * 1024    # safe scoped-VMEM budget on v5e/v6e/v7x


def _round_up(x, m):
    return ((x + m - 1) // m) * m


def _pad2d(x, rows, cols):
    r, c = x.shape
    if r == rows and c == cols:
        return x
    return jnp.pad(x, ((0, rows - r), (0, cols - c)))


# ----------------------------------------------------------------------------
# Tiled matmul with fused BN-affine / residual / ReLU epilogue
# ----------------------------------------------------------------------------

def _matmul_affine_kernel(*refs, relu, has_residual):
    if has_residual:
        x_ref, w_ref, s_ref, b_ref, r_ref, o_ref, acc_ref = refs
    else:
        x_ref, w_ref, s_ref, b_ref, o_ref, acc_ref = refs
        r_ref = None

    k = pl.program_id(2)

    @pl.when(k == 0)
    def _init():
        acc_ref[...] = jnp.zeros_like(acc_ref)

    acc_ref[...] += jnp.dot(x_ref[...], w_ref[...],
                            preferred_element_type=jnp.float32)

    @pl.when(k == pl.num_programs(2) - 1)
    def _finish():
        y = acc_ref[...] * s_ref[...] + b_ref[...]
        if r_ref is not None:
            y = y + r_ref[...].astype(jnp.float32)
        if relu:
            y = jnp.maximum(y, 0.0)
        o_ref[...] = y.astype(o_ref.dtype)


def matmul_affine(x, w, scale, bias, *, relu=False, residual=None,
                  out_dtype=ACT_DTYPE, tm=256, tn=256, tk=512):
    """y = [relu]((x @ w) * scale + bias [+ residual]).

    x: (M, K), w: (K, N), scale/bias: (N,) f32, residual: (M, N) or None.
    bf16 MXU operands, f32 accumulation in a VMEM scratch, epilogue fused on the last K step.
    """
    M, K = x.shape
    K2, N = w.shape
    assert K == K2

    if M > tm:
        Mp, bm = _round_up(M, tm), tm
    else:
        Mp = _round_up(M, 16)
        bm = Mp
    if N > tn:
        Np, bn = _round_up(N, tn), tn
    else:
        Np, bn = N, N
    if K > tk:
        Kp, bk = _round_up(K, tk), tk
    else:
        Kp = _round_up(K, 16)
        bk = Kp

    xp = _pad2d(x, Mp, Kp).astype(jnp.bfloat16)
    wp = _pad2d(w, Kp, Np).astype(jnp.bfloat16)
    sp = _pad2d(scale.reshape(1, N).astype(jnp.float32), 1, Np)
    bp = _pad2d(bias.reshape(1, N).astype(jnp.float32), 1, Np)

    args = [xp, wp, sp, bp]
    in_specs = [
        pl.BlockSpec((bm, bk), lambda i, j, k: (i, k)),
        pl.BlockSpec((bk, bn), lambda i, j, k: (k, j)),
        pl.BlockSpec((1, bn), lambda i, j, k: (0, j)),
        pl.BlockSpec((1, bn), lambda i, j, k: (0, j)),
    ]
    has_residual = residual is not None
    if has_residual:
        rp = _pad2d(residual, Mp, Np).astype(ACT_DTYPE)
        args.append(rp)
        in_specs.append(pl.BlockSpec((bm, bn), lambda i, j, k: (i, j)))

    grid = (Mp // bm, Np // bn, Kp // bk)
    flops = 2 * Mp * Np * Kp
    bytes_accessed = xp.size * 2 + wp.size * 2 + Mp * Np * 4 + (Mp * Np * 2 if has_residual else 0)

    out = pl.pallas_call(
        functools.partial(_matmul_affine_kernel, relu=relu, has_residual=has_residual),
        out_shape=jax.ShapeDtypeStruct((Mp, Np), out_dtype),
        grid_spec=pltpu.PrefetchScalarGridSpec(
            num_scalar_prefetch=0,
            grid=grid,
            in_specs=in_specs,
            out_specs=pl.BlockSpec((bm, bn), lambda i, j, k: (i, j)),
            scratch_shapes=[pltpu.VMEM((bm, bn), jnp.float32)],
        ),
        compiler_params=pltpu.CompilerParams(
            dimension_semantics=("parallel", "parallel", "arbitrary"),
            vmem_limit_bytes=_VMEM_LIMIT),
        cost_estimate=pl.CostEstimate(flops=flops, transcendentals=0,
                                      bytes_accessed=bytes_accessed),
    )(*args)
    return out[:M, :N]


# ----------------------------------------------------------------------------
# Fused 3x3 (stride-1, pad-1) conv + BN (+ReLU) kernel, no HBM im2col
# ----------------------------------------------------------------------------

def _conv3x3_kernel(x0_ref, x1_ref, x2_ref, w_ref, s_ref, b_ref, o_ref, *, relu):
    wo = o_ref.shape[2]
    rows = (x0_ref, x1_ref, x2_ref)
    acc = None
    for dh in range(3):
        for dw in range(3):
            tap = rows[dh][0, 0, dw:dw + wo, :]                    # (wo, Cin) bf16
            part = jnp.dot(tap, w_ref[dh, dw, :, :],
                           preferred_element_type=jnp.float32)     # (wo, Cout) f32
            acc = part if acc is None else acc + part
    y = acc * s_ref[...] + b_ref[...]
    if relu:
        y = jnp.maximum(y, 0.0)
    o_ref[0, 0, :, :] = y.astype(o_ref.dtype)


def conv3x3_bn(x, w_pt, bnp, relu=True):
    """3x3 stride-1 pad-1 conv + folded BN (+ReLU) as one Pallas kernel.

    Row taps come from three row-shifted BlockSpec streams over the same padded NHWC input
    (H block size 1 -> element-offset index maps), column taps are static in-kernel slices.
    """
    N, H, W, Cin = x.shape
    Cout = w_pt.shape[0]
    xp = jnp.pad(x.astype(ACT_DTYPE), ((0, 0), (1, 1), (1, 1), (0, 0)))
    Wp = W + 2
    wk = jnp.transpose(w_pt, (2, 3, 1, 0)).astype(jnp.bfloat16)    # (3, 3, Cin, Cout)
    scale, bias = fold_bn(bnp)
    sp = scale.reshape(1, Cout).astype(jnp.float32)
    bp = bias.reshape(1, Cout).astype(jnp.float32)

    def row_spec(dh):
        return pl.BlockSpec((1, 1, Wp, Cin), lambda n, i, dh=dh: (n, i + dh, 0, 0))

    out = pl.pallas_call(
        functools.partial(_conv3x3_kernel, relu=relu),
        out_shape=jax.ShapeDtypeStruct((N, H, W, Cout), ACT_DTYPE),
        grid_spec=pltpu.PrefetchScalarGridSpec(
            num_scalar_prefetch=0,
            grid=(N, H),
            in_specs=[
                row_spec(0), row_spec(1), row_spec(2),
                pl.BlockSpec((3, 3, Cin, Cout), lambda n, i: (0, 0, 0, 0)),
                pl.BlockSpec((1, Cout), lambda n, i: (0, 0)),
                pl.BlockSpec((1, Cout), lambda n, i: (0, 0)),
            ],
            out_specs=pl.BlockSpec((1, 1, W, Cout), lambda n, i: (n, i, 0, 0)),
        ),
        compiler_params=pltpu.CompilerParams(
            dimension_semantics=("parallel", "parallel"),
            vmem_limit_bytes=_VMEM_LIMIT),
        cost_estimate=pl.CostEstimate(
            flops=2 * N * H * W * 9 * Cin * Cout, transcendentals=0,
            bytes_accessed=3 * xp.size * 2 + wk.size * 2 + N * H * W * Cout * 2),
    )(xp, xp, xp, wk, sp, bp)
    return out


# ----------------------------------------------------------------------------
# Attention-pool kernel: one grid step per batch element, lane-dense (1, C) output
# ----------------------------------------------------------------------------

def _attnpool_kernel(q_ref, k_ref, v_ref, o_ref, *, heads, scale):
    outs = []
    for h in range(heads):
        qh = q_ref[0, h, :, :].astype(jnp.float32)        # (1, hd)
        kh = k_ref[0, h, :, :].astype(jnp.float32)        # (T, hd)
        vh = v_ref[0, h, :, :].astype(jnp.float32)        # (T, hd)
        s = jax.lax.dot_general(qh, kh, (((1,), (1,)), ((), ())),
                                preferred_element_type=jnp.float32) * scale   # (1, T)
        s = s - jnp.max(s, axis=-1, keepdims=True)
        p = jnp.exp(s)
        p = p / jnp.sum(p, axis=-1, keepdims=True)
        outs.append(jnp.dot(p, vh, preferred_element_type=jnp.float32))       # (1, hd)
    o_ref[0, :, :] = jnp.concatenate(outs, axis=-1).astype(o_ref.dtype)       # (1, C)


def attnpool_attention(q, k, v, heads, scale):
    """q: (N, C), k/v: (N, T, C) float32.  Returns (N, C) float32."""
    N, T, C = k.shape
    hd = C // heads
    qh = q.reshape(N, 1, heads, hd).transpose(0, 2, 1, 3)   # (N, heads, 1, hd)
    kh = k.reshape(N, T, heads, hd).transpose(0, 2, 1, 3)   # (N, heads, T, hd)
    vh = v.reshape(N, T, heads, hd).transpose(0, 2, 1, 3)
    out = pl.pallas_call(
        functools.partial(_attnpool_kernel, heads=heads, scale=scale),
        out_shape=jax.ShapeDtypeStruct((N, 1, C), jnp.float32),
        grid_spec=pltpu.PrefetchScalarGridSpec(
            num_scalar_prefetch=0,
            grid=(N,),
            in_specs=[
                pl.BlockSpec((1, heads, 1, hd), lambda n: (n, 0, 0, 0)),
                pl.BlockSpec((1, heads, T, hd), lambda n: (n, 0, 0, 0)),
                pl.BlockSpec((1, heads, T, hd), lambda n: (n, 0, 0, 0)),
            ],
            out_specs=pl.BlockSpec((1, 1, C), lambda n: (n, 0, 0)),
        ),
        compiler_params=pltpu.CompilerParams(dimension_semantics=("parallel",)),
    )(qh, kh, vh)
    return out.reshape(N, C)


# ----------------------------------------------------------------------------
# Plain-JAX glue (layout, param folding, small pooling)
# ----------------------------------------------------------------------------

def fold_bn(bnp, eps=1e-5):
    # TODO(synk): BatchNorm is eval-mode only (running stats folded into scale/bias).
    scale = bnp["gamma"] / jnp.sqrt(bnp["var"] + eps)
    bias = bnp["beta"] - bnp["mean"] * scale
    return scale, bias


def im2col(x, ksize, stride, pad):
    """x: NHWC.  Only used for the tiny stride-2 stem conv (Cin=3)."""
    N, H, W, C = x.shape
    xp = jnp.pad(x, ((0, 0), (pad, pad), (pad, pad), (0, 0)))
    Ho = (H + 2 * pad - ksize) // stride + 1
    Wo = (W + 2 * pad - ksize) // stride + 1
    cols = []
    for di in range(ksize):
        for dj in range(ksize):
            cols.append(xp[:, di:di + stride * Ho:stride, dj:dj + stride * Wo:stride, :])
    out = jnp.concatenate(cols, axis=-1)
    return out.reshape(N * Ho * Wo, ksize * ksize * C), (N, Ho, Wo)


def avgpool2d(x, k):
    # TODO(synk): plain-JAX reshape+mean; could be folded into the following 1x1-conv epilogue.
    N, H, W, C = x.shape
    return x.astype(jnp.float32).reshape(N, H // k, k, W // k, k, C).mean(
        axis=(2, 4)).astype(ACT_DTYPE)


def conv1x1_bn(x2d, w_pt, bnp, relu=False, residual=None):
    wm = jnp.transpose(w_pt[:, :, 0, 0], (1, 0))              # (Cin, Cout)
    scale, bias = fold_bn(bnp)
    return matmul_affine(x2d, wm, scale, bias, relu=relu, residual=residual)


# ----------------------------------------------------------------------------
# Model forward
# ----------------------------------------------------------------------------

def bottleneck_forward(x, p):
    N, H, W, Cin = x.shape
    stride = p["stride"]
    planes = p["conv1"].shape[0]

    out = conv1x1_bn(x.reshape(N * H * W, Cin), p["conv1"], p["bn1"], relu=True)
    out = out.reshape(N, H, W, planes)
    out = conv3x3_bn(out, p["conv2"], p["bn2"], relu=True)
    if stride > 1:
        out = avgpool2d(out, stride)
    Ho, Wo = out.shape[1], out.shape[2]

    if "ds_conv" in p:
        idn = avgpool2d(x, stride) if stride > 1 else x
        identity = conv1x1_bn(idn.reshape(N * Ho * Wo, Cin), p["ds_conv"], p["ds_bn"])
    else:
        identity = x.reshape(N * Ho * Wo, Cin)

    # conv3 + bn3 + residual-add + ReLU fused into one matmul epilogue
    y = conv1x1_bn(out.reshape(N * Ho * Wo, planes), p["conv3"], p["bn3"],
                   relu=True, residual=identity)
    return y.reshape(N, Ho, Wo, planes * 4)


def attnpool_forward(x, p, heads):
    """x: NHWC.  CLIP AttentionPool2d (query = mean token)."""
    N, H, W, C = x.shape
    tokens = x.reshape(N, H * W, C).astype(jnp.float32)         # token order = h*W + w
    mean = tokens.mean(axis=1, keepdims=True)
    tok = jnp.concatenate([mean, tokens], axis=1) + p["pos_emb"][None]   # (N, T, C)
    T = tok.shape[1]

    # fused q/k/v projection: one tiled matmul over (N*T, C) x (C, 3C)
    wqkv = jnp.concatenate([p["wq"].T, p["wk"].T, p["wv"].T], axis=1)
    bqkv = jnp.concatenate([p["bq"], p["bk"], p["bv"]])
    qkv = matmul_affine(tok.reshape(N * T, C), wqkv,
                        jnp.ones((3 * C,), jnp.float32), bqkv,
                        out_dtype=jnp.float32)
    qkv = qkv.reshape(N, T, 3 * C)
    q = qkv[:, 0, 0:C]                                          # query = mean token
    k = qkv[:, :, C:2 * C]
    v = qkv[:, :, 2 * C:3 * C]

    hd = C // heads
    o = attnpool_attention(q, k, v, heads, float(hd) ** -0.5)   # (N, C)
    return matmul_affine(o, p["wc"].T,
                         jnp.ones((p["wc"].shape[0],), jnp.float32), p["bc"],
                         out_dtype=jnp.float32)                 # (N, output_dim)


def modified_resnet_forward(x_nchw, params, heads):
    x = jnp.transpose(x_nchw, (0, 2, 3, 1)).astype(jnp.float32)   # NCHW -> NHWC

    # stem conv1 (3x3, stride 2): tiny plain-JAX im2col (Cin=3) + tiled fused matmul
    w1 = params["conv1"]
    cout = w1.shape[0]
    xm, (N, Ho, Wo) = im2col(x, 3, 2, 1)
    wm = jnp.transpose(w1, (2, 3, 1, 0)).reshape(9 * 3, cout)
    s1, b1 = fold_bn(params["bn1"])
    x = matmul_affine(xm, wm, s1, b1, relu=True).reshape(N, Ho, Wo, cout)

    # stem conv2 / conv3: fused Pallas 3x3 conv kernels (no im2col)
    x = conv3x3_bn(x, params["conv2"], params["bn2"], relu=True)
    x = conv3x3_bn(x, params["conv3"], params["bn3"], relu=True)
    x = avgpool2d(x, 2)

    for layer in params["layers"]:
        for block in layer:
            x = bottleneck_forward(x, block)

    return attnpool_forward(x, params["attnpool"], heads)


# ----------------------------------------------------------------------------
# Deterministic synthetic parameter construction (shapes follow the PyTorch __init__)
# ----------------------------------------------------------------------------

def init_params(key, layers, output_dim, heads, input_resolution, width):
    keys = iter(jax.random.split(key, 512))
    nk = lambda: next(keys)

    def conv_w(cout, cin, k):
        fan_in = cin * k * k
        return jax.random.normal(nk(), (cout, cin, k, k), jnp.float32) / jnp.sqrt(float(fan_in))

    def bn(c):
        return dict(
            gamma=1.0 + 0.1 * jax.random.normal(nk(), (c,), jnp.float32),
            beta=0.1 * jax.random.normal(nk(), (c,), jnp.float32),
            mean=0.1 * jax.random.normal(nk(), (c,), jnp.float32),
            var=1.0 + 0.1 * jnp.abs(jax.random.normal(nk(), (c,), jnp.float32)),
        )

    def bottleneck_params(inplanes, planes, stride):
        p = dict(
            stride=stride,
            conv1=conv_w(planes, inplanes, 1), bn1=bn(planes),
            conv2=conv_w(planes, planes, 3), bn2=bn(planes),
            conv3=conv_w(planes * 4, planes, 1), bn3=bn(planes * 4),
        )
        if stride > 1 or inplanes != planes * 4:
            p["ds_conv"] = conv_w(planes * 4, inplanes, 1)
            p["ds_bn"] = bn(planes * 4)
        return p

    params = dict(
        conv1=conv_w(width // 2, 3, 3), bn1=bn(width // 2),
        conv2=conv_w(width // 2, width // 2, 3), bn2=bn(width // 2),
        conv3=conv_w(width, width // 2, 3), bn3=bn(width),
    )

    inplanes = width
    all_layers = []
    for li, nblocks in enumerate(layers):
        planes = width * (2 ** li)
        stride = 1 if li == 0 else 2
        blocks = [bottleneck_params(inplanes, planes, stride)]
        inplanes = planes * 4
        for _ in range(1, nblocks):
            blocks.append(bottleneck_params(inplanes, planes, 1))
        all_layers.append(blocks)
    params["layers"] = all_layers

    embed_dim = width * 32
    spacial = input_resolution // 32
    std = embed_dim ** -0.5
    params["attnpool"] = dict(
        pos_emb=jax.random.normal(nk(), (spacial * spacial + 1, embed_dim), jnp.float32) * std,
        wq=jax.random.normal(nk(), (embed_dim, embed_dim), jnp.float32) * std,
        bq=0.01 * jax.random.normal(nk(), (embed_dim,), jnp.float32),
        wk=jax.random.normal(nk(), (embed_dim, embed_dim), jnp.float32) * std,
        bk=0.01 * jax.random.normal(nk(), (embed_dim,), jnp.float32),
        wv=jax.random.normal(nk(), (embed_dim, embed_dim), jnp.float32) * std,
        bv=0.01 * jax.random.normal(nk(), (embed_dim,), jnp.float32),
        wc=jax.random.normal(nk(), (output_dim, embed_dim), jnp.float32) * std,
        bc=0.01 * jax.random.normal(nk(), (output_dim,), jnp.float32),
    )
    return params


# ----------------------------------------------------------------------------

if __name__ == "__main__":
    # Small config: layers=[1,1,1,1], width=8 -> embed_dim=256, heads=4 (head_dim=64),
    # input_resolution=64 -> final feature map 2x2 -> 5 attention tokens.
    layers = [1, 1, 1, 1]
    output_dim = 32
    heads = 4
    input_resolution = 64
    width = 8

    key = jax.random.PRNGKey(0)
    kp, kx = jax.random.split(key)
    params = init_params(kp, layers, output_dim, heads, input_resolution, width)
    x = jax.random.normal(kx, (2, 3, input_resolution, input_resolution), jnp.float32)

    out = modified_resnet_forward(x, params, heads)
    out = jax.block_until_ready(out)
    assert out.shape == (2, output_dim), out.shape
    assert bool(jnp.all(jnp.isfinite(out)))
    print("KERNEL_OK")
</pallas_src>

<mosaic_0001>
module attributes {stable_mosaic.version = 11 : i64} {
  func.func @_matmul_affine_kernel(%arg0: i32, %arg1: i32, %arg2: i32, %arg3: memref<256x32xbf16, #tpu.memory_space<vmem>>, %arg4: memref<32x4xbf16, #tpu.memory_space<vmem>>, %arg5: memref<1x4xf32, #tpu.memory_space<vmem>>, %arg6: memref<1x4xf32, #tpu.memory_space<vmem>>, %arg7: memref<256x4xbf16, #tpu.memory_space<vmem>>, %arg8: memref<256x4xf32, #tpu.memory_space<vmem>>) attributes {dimension_semantics = [#tpu.dimension_semantics<parallel>, #tpu.dimension_semantics<parallel>, #tpu.dimension_semantics<arbitrary>], iteration_bounds = array<i64: 8, 1, 1>, scalar_prefetch = 0 : i64, scratch_operands = 1 : i64, tpu.core_type = #tpu.core_type<tc>, window_params = [{transform_indices = @transform_0, window_bounds = array<i64: 256, 32>}, {transform_indices = @transform_1, window_bounds = array<i64: 32, 4>}, {transform_indices = @transform_2, window_bounds = array<i64: 1, 4>}, {transform_indices = @transform_3, window_bounds = array<i64: 1, 4>}, {transform_indices = @transform_4, window_bounds = array<i64: 256, 4>}]} {
    %c0_i32 = arith.constant 0 : i32
    %0 = arith.cmpi eq, %arg2, %c0_i32 : i32
    %1 = arith.extui %0 : i1 to i32
    %c0_i32_0 = arith.constant 0 : i32
    %2 = arith.cmpi ne, %1, %c0_i32_0 : i32
    scf.if %2 {
      %cst_10 = arith.constant 0.000000e+00 : f32
      %12 = vector.broadcast %cst_10 : f32 to vector<256x4xf32>
      %c0_11 = arith.constant 0 : index
      %c0_12 = arith.constant 0 : index
      %13 = vector.load %arg8[%c0_11, %c0_12] : memref<256x4xf32, #tpu.memory_space<vmem>>, vector<256x4xf32>
      tpu.vector_store %arg8[%c0_11, %c0_12], %12 {strides = array<i32>} : memref<256x4xf32, #tpu.memory_space<vmem>>, vector<256x4xf32>,
    } else {
    }
    %c0 = arith.constant 0 : index
    %c0_1 = arith.constant 0 : index
    %3 = vector.load %arg8[%c0, %c0_1] : memref<256x4xf32, #tpu.memory_space<vmem>>, vector<256x4xf32>
    %c0_2 = arith.constant 0 : index
    %c0_3 = arith.constant 0 : index
    %4 = vector.load %arg3[%c0_2, %c0_3] : memref<256x32xbf16, #tpu.memory_space<vmem>>, vector<256x32xbf16>
    %c0_4 = arith.constant 0 : index
    %c0_5 = arith.constant 0 : index
    %5 = vector.load %arg4[%c0_4, %c0_5] : memref<32x4xbf16, #tpu.memory_space<vmem>>, vector<32x4xbf16>
    %cst = arith.constant dense<0.000000e+00> : vector<256x4xf32>
    %6 = tpu.matmul %4, %5, %cst {dimension_numbers = #tpu.dot_dimension_numbers<[1], [0], [0], [1], [0, 0, 1, 1], [], []>} : vector<256x32xbf16>, vector<32x4xbf16>, vector<256x4xf32> -> vector<256x4xf32>
    %7 = arith.addf %3, %6 : vector<256x4xf32>
    %c0_6 = arith.constant 0 : index
    %c0_7 = arith.constant 0 : index
    %8 = vector.load %arg8[%c0_6, %c0_7] : memref<256x4xf32, #tpu.memory_space<vmem>>, vector<256x4xf32>
    tpu.vector_store %arg8[%c0_6, %c0_7], %7 {strides = array<i32>} : memref<256x4xf32, #tpu.memory_space<vmem>>, vector<256x4xf32>,
    %c0_i32_8 = arith.constant 0 : i32
    %9 = arith.cmpi eq, %arg2, %c0_i32_8 : i32
    %10 = arith.extui %9 : i1 to i32
    %c0_i32_9 = arith.constant 0 : i32
    %11 = arith.cmpi ne, %10, %c0_i32_9 : i32
    scf.if %11 {
      %c0_10 = arith.constant 0 : index
      %c0_11 = arith.constant 0 : index
      %12 = vector.load %arg8[%c0_10, %c0_11] : memref<256x4xf32, #tpu.memory_space<vmem>>, vector<256x4xf32>
      %c0_12 = arith.constant 0 : index
      %c0_13 = arith.constant 0 : index
      %13 = vector.load %arg5[%c0_12, %c0_13] : memref<1x4xf32, #tpu.memory_space<vmem>>, vector<1x4xf32>
      %14 = vector.broadcast %13 : vector<1x4xf32> to vector<256x4xf32>
      %15 = arith.mulf %12, %14 : vector<256x4xf32>
      %c0_14 = arith.constant 0 : index
      %c0_15 = arith.constant 0 : index
      %16 = vector.load %arg6[%c0_14, %c0_15] : memref<1x4xf32, #tpu.memory_space<vmem>>, vector<1x4xf32>
      %17 = vector.broadcast %16 : vector<1x4xf32> to vector<256x4xf32>
      %18 = arith.addf %15, %17 : vector<256x4xf32>
      %cst_16 = arith.constant 0.000000e+00 : f32
      %19 = vector.broadcast %cst_16 : f32 to vector<256x4xf32>
      %20 = arith.maximumf %18, %19 : vector<256x4xf32>
      %21 = arith.truncf %20 : vector<256x4xf32> to vector<256x4xbf16>
      %c0_17 = arith.constant 0 : index
      %c0_18 = arith.constant 0 : index
      %22 = vector.load %arg7[%c0_17, %c0_18] : memref<256x4xbf16, #tpu.memory_space<vmem>>, vector<256x4xbf16>
      tpu.vector_store %arg7[%c0_17, %c0_18], %21 {strides = array<i32>} : memref<256x4xbf16, #tpu.memory_space<vmem>>, vector<256x4xbf16>,
    } else {
    }
    return
  }
  func.func @transform_0(%arg0: i32, %arg1: i32, %arg2: i32) -> (i32, i32) {
    %c0_i32 = arith.constant 0 : i32
    return %arg0, %arg2 : i32, i32
  }
  func.func @transform_1(%arg0: i32, %arg1: i32, %arg2: i32) -> (i32, i32) {
    %c0_i32 = arith.constant 0 : i32
    return %arg2, %arg1 : i32, i32
  }
  func.func @transform_2(%arg0: i32, %arg1: i32, %arg2: i32) -> (i32, i32) {
    %c0_i32 = arith.constant 0 : i32
    %c0_i32_0 = arith.constant 0 : i32
    return %c0_i32, %arg1 : i32, i32
  }
  func.func @transform_3(%arg0: i32, %arg1: i32, %arg2: i32) -> (i32, i32) {
    %c0_i32 = arith.constant 0 : i32
    %c0_i32_0 = arith.constant 0 : i32
    return %c0_i32, %arg1 : i32, i32
  }
  func.func @transform_4(%arg0: i32, %arg1: i32, %arg2: i32) -> (i32, i32) {
    %c0_i32 = arith.constant 0 : i32
    return %arg0, %arg1 : i32, i32
  }
}

</mosaic_0001>

<bundles_post_ra>
// kernel: tpu_custom_call.1
= control target key start
LH: loop header
LB: loop body
LE: loop exit
PB: predicated region body
PF: predicated region fallthrough
CT: control target
= control target key end

     0   :  { %s1467_s15 = smov 0   ;;  %s1469_s16 = smov 0   ;;  %s1775_s0 = inlined_call_operand.vmem [shape: bf16[2048,32], index: 0, kind: input, shape index: {}]   ;;  %s1776_s1 = inlined_call_operand.vmem [shape: bf16[32,4], index: 1, kind: input, shape index: {}]   ;;  %s1777_s2 = inlined_call_operand.vmem [shape: f32[1,4], index: 2, kind: input, shape index: {}]   ;;  %s1778_s3 = inlined_call_operand.vmem [shape: f32[1,4], index: 3, kind: input, shape index: {}]   ;;  %s1779_s4 = inlined_call_operand.vmem [shape: bf16[2048,4], index: 4, kind: output, shape index: {}]  }
   0x1   :  { %s1471_s17 = smov 0  }
   0x2 LB: > { %s33_s18 = sadd.s32 1, %s1435_s16  ;;  %p1209_p0 = scmp.ge.s32.totalorder %s1439_s17, 1  ;;  %s1439_s17 = sphi %s1471_s17, %s14_s17   ;;  %s1435_s16 = sphi %s1469_s16, %s1781_s16   ;;  %s1431_s15 = sphi %s1467_s15, %s1780_s15  }
   0x3   : > { %p35_p1 = scmp.ge.s32.totalorder %s33_s18, 8  ;;  %p221_p2 = scmp.lt.s32.totalorder %s1439_s17, 9 }
   0x5   : > { %s1783_s18 = smov (%p35_p1, %s33_s18), 0  ;;  %p222_p3 = pnand %p1209_p0, %p221_p2 }
   0x6   : > { %v1399_v0 = vld [vmem:[%s1776_s1] sm:$0xff] (!%p222_p3)   ;;  %s1210_s21 = sshll.u32 (!%p222_p3), %s1431_s15, 5  ;;  %v1400_v1 = vld [vmem:[%s1776_s1 + $0x8] sm:$0xff] (!%p222_p3)   ;;  %vm305_vm0 = vcmask (!%p222_p3), 31744   ;;  %v1441_v2 = vmov (!%p222_p3), 0.0   ;;  %vm498_vm1 = vcmask (!%p222_p3), 261120  }
   0x7   : > { %225 = sbr.rel (%p222_p3) target bundleno = 291 (0x123), region = 36  ;;  %p268_p4 = scmp.lt.s32.totalorder (!%p222_p3), %s1210_s21, 255  ;;  %1334 = vmatprep.subr.bf16.mxu0 (!%p222_p3), %v1399_v0  ;;  %1370 = vmatprep.subr.bf16.mxu1 (!%p222_p3), %v1399_v0  ;;  %308 = vst.msk [vmem:[#allocation2 + $0x10] sm:$0xff] (!%p222_p3), %vm305_vm0, %v1441_v2  ;;  %306 = vst.msk [vmem:[#allocation2] sm:$0xff] (!%p222_p3), %vm305_vm0, %v1441_v2  ;;  %v1576_v46 = vld [vmem:[%s1777_s2] ss:$0 sm:$0xff] (!%p222_p3) }
   0x8   : > { %1335 = vmatpush3.bf16.msra.mxu0 (!%p222_p3), %v1399_v0  ;;  %1372 = vmatpush3.bf16.msra.mxu1 (!%p222_p3), %v1399_v0  ;;  %307 = vst.msk [vmem:[#allocation2 + $0x8] sm:$0xff] (!%p222_p3), %vm305_vm0, %v1441_v2  ;;  %309 = vst.msk [vmem:[#allocation2 + $0x18] sm:$0xff] (!%p222_p3), %vm305_vm0, %v1441_v2  ;;  %v1581_v56 = vld [vmem:[%s1778_s3] ss:$0 sm:$0xff] (!%p222_p3)  ;;  %vm1046_vm2 = vcmask (!%p222_p3), 27648  }
   0x9   : > { %310 = vst.msk [vmem:[#allocation2 + $0x20] sm:$0xff] (!%p222_p3), %vm305_vm0, %v1441_v2  ;;  %311 = vst.msk [vmem:[#allocation2 + $0x28] sm:$0xff] (!%p222_p3), %vm305_vm0, %v1441_v2  ;;  %1336 = vmatprep.subr.bf16.mxu0 (!%p222_p3), %v1400_v1  ;;  %1371 = vmatprep.subr.bf16.mxu1 (!%p222_p3), %v1400_v1 }
   0xa   : > { %312 = vst.msk [vmem:[#allocation2 + $0x30] sm:$0xff] (!%p222_p3), %vm305_vm0, %v1441_v2  ;;  %313 = vst.msk [vmem:[#allocation2 + $0x38] sm:$0xff] (!%p222_p3), %vm305_vm0, %v1441_v2 }
   0xb   : > { %314 = vst.msk [vmem:[#allocation2 + $0x40] sm:$0xff] (!%p222_p3), %vm305_vm0, %v1441_v2  ;;  %315 = vst.msk [vmem:[#allocation2 + $0x48] sm:$0xff] (!%p222_p3), %vm305_vm0, %v1441_v2 }
   0xc   : > { %316 = vst.msk [vmem:[#allocation2 + $0x50] sm:$0xff] (!%p222_p3), %vm305_vm0, %v1441_v2  ;;  %317 = vst.msk [vmem:[#allocation2 + $0x58] sm:$0xff] (!%p222_p3), %vm305_vm0, %v1441_v2  ;;  %1337 = vmatpush3.bf16.msra.mxu0 (!%p222_p3), %v1400_v1  ;;  %1373 = vmatpush3.bf16.msra.mxu1 (!%p222_p3), %v1400_v1 }
   0xd   : > { %318 = vst.msk [vmem:[#allocation2 + $0x60] sm:$0xff] (!%p222_p3), %vm305_vm0, %v1441_v2  ;;  %319 = vst.msk [vmem:[#allocation2 + $0x68] sm:$0xff] (!%p222_p3), %vm305_vm0, %v1441_v2 }
   0xe   : > { %s1785_s21 = smov (!%p268_p4, %s1210_s21), 255  ;;  %320 = vst.msk [vmem:[#allocation2 + $0x70] sm:$0xff] %vm305_vm0, %v1441_v2  ;;  %321 = vst.msk [vmem:[#allocation2 + $0x78] sm:$0xff] %vm305_vm0, %v1441_v2  ;;  %v340_v19 = vld [vmem:[#allocation2 + $0x10] sm:$0xff]  ;;  %v338_v21 = vld [vmem:[#allocation2] sm:$0xff] }
   0xf   : > { %322 = vst.msk [vmem:[#allocation2 + $0x80] sm:$0xff] %vm305_vm0, %v1441_v2  ;;  %323 = vst.msk [vmem:[#allocation2 + $0x88] sm:$0xff] %vm305_vm0, %v1441_v2  ;;  %s1211_s24 = sshll.u32 %s1785_s21, 2  ;;  %v341_v24 = vld [vmem:[#allocation2 + $0x18] sm:$0xff]  ;;  %v339_v29 = vld [vmem:[#allocation2 + $0x8] sm:$0xff] }
  0x10   : > { %324 = vst.msk [vmem:[#allocation2 + $0x90] sm:$0xff] %vm305_vm0, %v1441_v2  ;;  %325 = vst.msk [vmem:[#allocation2 + $0x98] sm:$0xff] %vm305_vm0, %v1441_v2  ;;  %s1531_s27 = scalar_lea.vmem %s1775_s0, %s1211_s24  ;;  %v342_v45 = vld [vmem:[#allocation2 + $0x20] sm:$0xff]  ;;  %v343_v54 = vld [vmem:[#allocation2 + $0x28] sm:$0xff]  ;;  %s1609_s8 = scalar_lea.vmem %s1779_s4, %s1211_s24 }
  0x11   : > { %326 = vst.msk [vmem:[#allocation2 + $0xa0] sm:$0xff] %vm305_vm0, %v1441_v2  ;;  %327 = vst.msk [vmem:[#allocation2 + $0xa8] sm:$0xff] %vm305_vm0, %v1441_v2  ;;  %v1401_v3 = vld [vmem:[%s1531_s27] sm:$0xff]   ;;  %v1403_v5 = vld [vmem:[%s1531_s27 + $0x8] sm:$0xff]  }
  0x12   : > { %328 = vst.msk [vmem:[#allocation2 + $0xb0] sm:$0xff] %vm305_vm0, %v1441_v2  ;;  %329 = vst.msk [vmem:[#allocation2 + $0xb8] sm:$0xff] %vm305_vm0, %v1441_v2  ;;  %v1402_v4 = vld [vmem:[%s1531_s27 + $0x40] sm:$0xff]   ;;  %1338 = vmatprep.mubr.msk.bf16.mxu0 %vm498_vm1, %v1401_v3  ;;  %v1404_v6 = vld [vmem:[%s1531_s27 + $0x48] sm:$0xff]  }
  0x13   : > { %330 = vst.msk [vmem:[#allocation2 + $0xc0] sm:$0xff] %vm305_vm0, %v1441_v2  ;;  %331 = vst.msk [vmem:[#allocation2 + $0xc8] sm:$0xff] %vm305_vm0, %v1441_v2  ;;  %1354 = vmatprep.mubr.msk.bf16.mxu1 %vm498_vm1, %v1402_v4  ;;  %1339 = vmatmul.mubr.msk.bf16.vlgmr.msra.gmra.mrb[0].mxu0 %vm498_vm1, %v1403_v5  ;;  %v1405_v7 = vld [vmem:[%s1531_s27 + $0x10] sm:$0xff]   ;;  %v1407_v9 = vld [vmem:[%s1531_s27 + $0x18] sm:$0xff]  }
  0x14   : > { %332 = vst.msk [vmem:[#allocation2 + $0xd0] sm:$0xff] %vm305_vm0, %v1441_v2  ;;  %333 = vst.msk [vmem:[#allocation2 + $0xd8] sm:$0xff] %vm305_vm0, %v1441_v2  ;;  %1355 = vmatmul.mubr.msk.bf16.vlgmr.msra.gmra.mrb[0].mxu1 %vm498_vm1, %v1404_v6  ;;  %v1406_v8 = vld [vmem:[%s1531_s27 + $0x50] sm:$0xff]   ;;  %1342 = vmatprep.mubr.msk.bf16.mxu0 %vm498_vm1, %v1405_v7  ;;  %v1408_v10 = vld [vmem:[%s1531_s27 + $0x58] sm:$0xff]  }
  0x15   : > { %334 = vst.msk [vmem:[#allocation2 + $0xe0] sm:$0xff] %vm305_vm0, %v1441_v2  ;;  %335 = vst.msk [vmem:[#allocation2 + $0xe8] sm:$0xff] %vm305_vm0, %v1441_v2  ;;  %1358 = vmatprep.mubr.msk.bf16.mxu1 %vm498_vm1, %v1406_v8  ;;  %v1409_v11 = vld [vmem:[%s1531_s27 + $0x20] sm:$0xff]   ;;  %v1411_v13 = vld [vmem:[%s1531_s27 + $0x28] sm:$0xff]  }
  0x16   : > { %336 = vst.msk [vmem:[#allocation2 + $0xf0] sm:$0xff] %vm305_vm0, %v1441_v2  ;;  %337 = vst.msk [vmem:[#allocation2 + $0xf8] sm:$0xff] %vm305_vm0, %v1441_v2  ;;  %v1410_v12 = vld [vmem:[%s1531_s27 + $0x60] sm:$0xff]   ;;  %v1412_v14 = vld [vmem:[%s1531_s27 + $0x68] sm:$0xff]  }
  0x17   : > { %v1413_v15 = vld [vmem:[%s1531_s27 + $0x30] sm:$0xff]   ;;  %v1415_v17 = vld [vmem:[%s1531_s27 + $0x38] sm:$0xff]   ;;  %v354_v23 = vld [vmem:[#allocation2 + $0x80] sm:$0xff] }
  0x18   : > { %v1414_v16 = vld [vmem:[%s1531_s27 + $0x70] sm:$0xff]   ;;  %v1416_v18 = vld [vmem:[%s1531_s27 + $0x78] sm:$0xff]   ;;  %v355_v34 = vld [vmem:[#allocation2 + $0x88] sm:$0xff] }
  0x19   : > { %v356_v20 = vld [vmem:[#allocation2 + $0x90] sm:$0xff]  ;;  %v357_v28 = vld [vmem:[#allocation2 + $0x98] sm:$0xff]  ;;  %v358_v48 = vld [vmem:[#allocation2 + $0xa0] sm:$0xff] }
  0x1a   : > { %v344_v43 = vld [vmem:[#allocation2 + $0x30] sm:$0xff]  ;;  %v345_v49 = vld [vmem:[#allocation2 + $0x38] sm:$0xff]  ;;  %v359_v61 = vld [vmem:[#allocation2 + $0xa8] sm:$0xff] }
  0x1b   : > { %1343 = vmatmul.mubr.msk.bf16.gmra.mrb[4].mxu0 %vm498_vm1, %v1407_v9  ;;  %v360_v44 = vld [vmem:[#allocation2 + $0xb0] sm:$0xff]  ;;  %v361_v53 = vld [vmem:[#allocation2 + $0xb8] sm:$0xff] }
  0x1c   : > { %1359 = vmatmul.mubr.msk.bf16.gmra.mrb[4].mxu1 %vm498_vm1, %v1408_v10  ;;  %1346 = vmatprep.mubr.msk.bf16.mxu0 %vm498_vm1, %v1409_v11 }
  0x1d   : > { %1362 = vmatprep.mubr.msk.bf16.mxu1 %vm498_vm1, %v1410_v12 }
  0x23   : > { %1347 = vmatmul.mubr.msk.bf16.gmra.mrb[8].mxu0 %vm498_vm1, %v1411_v13 }
  0x24   : > { %1363 = vmatmul.mubr.msk.bf16.gmra.mrb[8].mxu1 %vm498_vm1, %v1412_v14  ;;  %1350 = vmatprep.mubr.msk.bf16.mxu0 %vm498_vm1, %v1413_v15 }
  0x25   : > { %1366 = vmatprep.mubr.msk.bf16.mxu1 %vm498_vm1, %v1414_v16 }
  0x2b   : > { %1351 = vmatmul.mubr.msk.bf16.gmra.mrb[12].mxu0 %vm498_vm1, %v1415_v17 }
  0x2c   : > { %1367 = vmatmul.mubr.msk.bf16.gmra.mrb[12].mxu1 %vm498_vm1, %v1416_v18 }
  0xe6   : > { %v1340_v22 = vpop.f32.mrb[0].mxu0 }
  0xe7   : > { %v710_v25 = vadd.f32 %v1340_v22, %v340_v19  ;;  %v1356_v26 = vpop.f32.mrb[0].mxu1  ;;  %v581_v27 = vpop.f32.mrb[1].mxu0 }
  0xe8   : > { %v726_v30 = vadd.f32 %v1356_v26, %v356_v20  ;;  %v708_v31 = vadd.f32 %v581_v27, %v338_v21  ;;  %v645_v32 = vpop.f32.mrb[1].mxu1  ;;  %v1341_v33 = vpop.f32.mrb[2].mxu0 }
  0xe9   : > { %743 = vst.msk [vmem:[#allocation2 + $0x10] sm:$0xff] %vm305_vm0, %v710_v25  ;;  %v724_v35 = vadd.f32 %v645_v32, %v354_v23  ;;  %v711_v36 = vadd.f32 %v1341_v33, %v341_v24  ;;  %v1357_v37 = vpop.f32.mrb[2].mxu1  ;;  %v584_v38 = vpop.f32.mrb[3].mxu0 }
  0xea   : > { %759 = vst.msk [vmem:[#allocation2 + $0x90] sm:$0xff] %vm305_vm0, %v726_v30  ;;  %741 = vst.msk [vmem:[#allocation2] sm:$0xff] %vm305_vm0, %v708_v31  ;;  %v727_v39 = vadd.f32 %v1357_v37, %v357_v28  ;;  %v709_v40 = vadd.f32 %v584_v38, %v339_v29  ;;  %v648_v41 = vpop.f32.mrb[3].mxu1 }
  0xeb   : > { %757 = vst.msk [vmem:[#allocation2 + $0x80] sm:$0xff] %vm305_vm0, %v724_v35  ;;  %744 = vst.msk [vmem:[#allocation2 + $0x18] sm:$0xff] %vm305_vm0, %v711_v36  ;;  %v725_v42 = vadd.f32 %v648_v41, %v355_v34 }
  0xec   : > { %760 = vst.msk [vmem:[#allocation2 + $0x98] sm:$0xff] %vm305_vm0, %v727_v39  ;;  %742 = vst.msk [vmem:[#allocation2 + $0x8] sm:$0xff] %vm305_vm0, %v709_v40 }
  0xed   : > { %758 = vst.msk [vmem:[#allocation2 + $0x88] sm:$0xff] %vm305_vm0, %v725_v42 }
  0xee   : > { %v1344_v47 = vpop.f32.mrb[4].mxu0 }
  0xef   : > { %v714_v50 = vadd.f32 %v1344_v47, %v344_v43  ;;  %v1360_v51 = vpop.f32.mrb[4].mxu1  ;;  %v597_v52 = vpop.f32.mrb[5].mxu0 }
  0xf0   : > { %v778_v55 = vld [vmem:[#allocation2 + $0x10] sm:$0xff]  ;;  %v730_v57 = vadd.f32 %v1360_v51, %v360_v44  ;;  %v712_v58 = vadd.f32 %v597_v52, %v342_v45  ;;  %v661_v59 = vpop.f32.mrb[5].mxu1  ;;  %v1345_v60 = vpop.f32.mrb[6].mxu0 }
  0xf1   : > { %v817_v62 = vmul.f32 %v1576_v46, %v778_v55  ;;  %v794_v63 = vld [vmem:[#allocation2 + $0x90] sm:$0xff]  ;;  %v776_v0 = vld [vmem:[#allocation2] sm:$0xff]  ;;  %747 = vst.msk [vmem:[#allocation2 + $0x30] sm:$0xff] %vm305_vm0, %v714_v50  ;;  %v728_v1 = vadd.f32 %v661_v59, %v358_v48  ;;  %v715_v2 = vadd.f32 %v1345_v60, %v345_v49  ;;  %v1361_v3 = vpop.f32.mrb[6].mxu1  ;;  %v600_v4 = vpop.f32.mrb[7].mxu0 }
  0xf2   : > { %v833_v5 = vmul.f32 %v1576_v46, %v794_v63  ;;  %v815_v6 = vmul.f32 %v1576_v46, %v776_v0  ;;  %v792_v7 = vld [vmem:[#allocation2 + $0x80] sm:$0xff]  ;;  %v779_v8 = vld [vmem:[#allocation2 + $0x18] sm:$0xff]  ;;  %763 = vst.msk [vmem:[#allocation2 + $0xb0] sm:$0xff] %vm305_vm0, %v730_v57  ;;  %745 = vst.msk [vmem:[#allocation2 + $0x20] sm:$0xff] %vm305_vm0, %v712_v58  ;;  %v731_v9 = vadd.f32 %v1361_v3, %v361_v53  ;;  %v664_v11 = vpop.f32.mrb[7].mxu1 }
  0xf3   : > { %v713_v10 = vadd.f32 %v600_v4, %v343_v54  ;;  %v856_v12 = vadd.f32 %v1581_v56, %v817_v62  ;;  %v831_v13 = vmul.f32 %v1576_v46, %v792_v7  ;;  %v818_v14 = vmul.f32 %v1576_v46, %v779_v8  ;;  %v795_v15 = vld [vmem:[#allocation2 + $0x98] sm:$0xff]  ;;  %v777_v16 = vld [vmem:[#allocation2 + $0x8] sm:$0xff]  ;;  %761 = vst.msk [vmem:[#allocation2 + $0xa0] sm:$0xff] %vm305_vm0, %v728_v1 }
  0xf4   : > { %748 = vst.msk [vmem:[#allocation2 + $0x38] sm:$0xff] %vm305_vm0, %v715_v2  ;;  %v729_v17 = vadd.f32 %v664_v11, %v359_v61  ;;  %v872_v18 = vadd.f32 %v1581_v56, %v833_v5  ;;  %v854_v19 = vadd.f32 %v1581_v56, %v815_v6  ;;  %v834_v20 = vmul.f32 %v1576_v46, %v795_v15  ;;  %v793_v22 = vld [vmem:[#allocation2 + $0x88] sm:$0xff] }
  0xf5   : > { %v816_v21 = vmul.f32 %v1576_v46, %v777_v16  ;;  %764 = vst.msk [vmem:[#allocation2 + $0xb8] sm:$0xff] %vm305_vm0, %v731_v9  ;;  %746 = vst.msk [vmem:[#allocation2 + $0x28] sm:$0xff] %vm305_vm0, %v713_v10  ;;  %v888_v23 = vmax.f32 %v856_v12, 0.0  ;;  %v870_v24 = vadd.f32 %v1581_v56, %v831_v13  ;;  %v857_v25 = vadd.f32 %v1581_v56, %v818_v14  ;;  %v348_v13 = vld [vmem:[#allocation2 + $0x50] sm:$0xff] }
  0xf6   : > { %v832_v26 = vmul.f32 %v1576_v46, %v793_v22  ;;  %762 = vst.msk [vmem:[#allocation2 + $0xa8] sm:$0xff] %vm305_vm0, %v729_v17  ;;  %v904_v27 = vmax.f32 %v872_v18, 0.0  ;;  %v886_v28 = vmax.f32 %v854_v19, 0.0  ;;  %v873_v29 = vadd.f32 %v1581_v56, %v834_v20  ;;  %v1613_v31 = vpop.f32.mrb[8].mxu0  ;;  %v364_v18 = vld [vmem:[#allocation2 + $0xd0] sm:$0xff]  ;;  %v346_v19 = vld [vmem:[#allocation2 + $0x40] sm:$0xff] }
  0xf7   : > { %v855_v30 = vadd.f32 %v1581_v56, %v816_v21  ;;  %v1286_v32 = vpack.c.bf16 %v888_v23, %v888_v23  ;;  %v902_v33 = vmax.f32 %v870_v24, 0.0  ;;  %v889_v34 = vmax.f32 %v857_v25, 0.0  ;;  %v1616_v36 = vpop.f32.mrb[8].mxu1  ;;  %v1618_v37 = vpop.f32.mrb[9].mxu0  ;;  %v362_v20 = vld [vmem:[#allocation2 + $0xc0] sm:$0xff] }
  0xf8   : > { %v871_v35 = vadd.f32 %v1581_v56, %v832_v26  ;;  %v1302_v38 = vpack.c.bf16 %v904_v27, %v904_v27  ;;  %v1284_v39 = vpack.c.bf16 %v886_v28, %v886_v28  ;;  %v905_v40 = vmax.f32 %v873_v29, 0.0  ;;  %v782_v42 = vld [vmem:[#allocation2 + $0x30] sm:$0xff]  ;;  %v1620_v43 = vpop.f32.mrb[9].mxu1  ;;  %v1622_v44 = vpop.f32.mrb[10].mxu0  ;;  %v349_v26 = vld [vmem:[#allocation2 + $0x58] sm:$0xff] }
  0xf9   : > { %v887_v41 = vmax.f32 %v855_v30, 0.0  ;;  %1049 = vst.msk [vmem:[%s1609_s8 + $0x8] sm:$0xf] %vm1046_vm2, %v1286_v32  ;;  %v1300_v45 = vpack.c.bf16 %v902_v33, %v902_v33  ;;  %v1287_v47 = vpack.c.bf16 %v889_v34, %v889_v34  ;;  %v821_v49 = vmul.f32 %v1576_v46, %v782_v42  ;;  %v798_v50 = vld [vmem:[#allocation2 + $0xb0] sm:$0xff]  ;;  %v780_v51 = vld [vmem:[#allocation2 + $0x20] sm:$0xff]  ;;  %v1627_v52 = vpop.f32.mrb[10].mxu1 }
  0xfa   : > { %v903_v48 = vmax.f32 %v871_v35, 0.0  ;;  %v1629_v53 = vpop.f32.mrb[11].mxu0  ;;  %1065 = vst.msk [vmem:[%s1609_s8 + $0x48] sm:$0xf] %vm1046_vm2, %v1302_v38  ;;  %1047 = vst.msk [vmem:[%s1609_s8] sm:$0xf] %vm1046_vm2, %v1284_v39  ;;  %v1303_v54 = vpack.c.bf16 %v905_v40, %v905_v40  ;;  %v837_v57 = vmul.f32 %v1576_v46, %v798_v50  ;;  %v819_v58 = vmul.f32 %v1576_v46, %v780_v51 }
  0xfb   : > { %v1285_v55 = vpack.c.bf16 %v887_v41, %v887_v41  ;;  %v796_v59 = vld [vmem:[#allocation2 + $0xa0] sm:$0xff]  ;;  %v783_v60 = vld [vmem:[#allocation2 + $0x38] sm:$0xff]  ;;  %v1637_v61 = vpop.f32.mrb[11].mxu1  ;;  %1063 = vst.msk [vmem:[%s1609_s8 + $0x40] sm:$0xf] %vm1046_vm2, %v1300_v45  ;;  %v860_v63 = vadd.f32 %v1581_v56, %v821_v49  ;;  %v347_v35 = vld [vmem:[#allocation2 + $0x48] sm:$0xff] }
  0xfc   : > { %1050 = vst.msk [vmem:[%s1609_s8 + $0xc] sm:$0xf] %vm1046_vm2, %v1287_v47  ;;  %v1301_v62 = vpack.c.bf16 %v903_v48, %v903_v48  ;;  %v835_v0 = vmul.f32 %v1576_v46, %v796_v59  ;;  %v822_v1 = vmul.f32 %v1576_v46, %v783_v60  ;;  %v799_v2 = vld [vmem:[#allocation2 + $0xb8] sm:$0xff]  ;;  %v781_v3 = vld [vmem:[#allocation2 + $0x28] sm:$0xff]  ;;  %1066 = vst.msk [vmem:[%s1609_s8 + $0x4c] sm:$0xf] %vm1046_vm2, %v1303_v54 }
  0xfd   : > { %1048 = vst.msk [vmem:[%s1609_s8 + $0x4] sm:$0xf] %vm1046_vm2, %v1285_v55  ;;  %v876_v4 = vadd.f32 %v1581_v56, %v837_v57  ;;  %v858_v5 = vadd.f32 %v1581_v56, %v819_v58  ;;  %v838_v6 = vmul.f32 %v1576_v46, %v799_v2  ;;  %v820_v7 = vmul.f32 %v1576_v46, %v781_v3  ;;  %v797_v8 = vld [vmem:[#allocation2 + $0xa8] sm:$0xff]  ;;  %v365_v27 = vld [vmem:[#allocation2 + $0xd8] sm:$0xff]  ;;  %v352_v48 = vld [vmem:[#allocation2 + $0x70] sm:$0xff] }
  0xfe   : > { %1064 = vst.msk [vmem:[%s1609_s8 + $0x44] sm:$0xf] %vm1046_vm2, %v1301_v62  ;;  %v892_v9 = vmax.f32 %v860_v63, 0.0  ;;  %v874_v10 = vadd.f32 %v1581_v56, %v835_v0  ;;  %v861_v11 = vadd.f32 %v1581_v56, %v822_v1  ;;  %v836_v12 = vmul.f32 %v1576_v46, %v797_v8  ;;  %v1352_v21 = vpop.f32.mrb[12].mxu0  ;;  %v363_v38 = vld [vmem:[#allocation2 + $0xc8] sm:$0xff]  ;;  %v368_v49 = vld [vmem:[#allocation2 + $0xf0] sm:$0xff] }
  0xff   : > { %v908_v14 = vmax.f32 %v876_v4, 0.0  ;;  %v890_v15 = vmax.f32 %v858_v5, 0.0  ;;  %v877_v16 = vadd.f32 %v1581_v56, %v838_v6  ;;  %v859_v17 = vadd.f32 %v1581_v56, %v820_v7  ;;  %v1368_v28 = vpop.f32.mrb[12].mxu1  ;;  %v629_v29 = vpop.f32.mrb[13].mxu0  ;;  %v350_v50 = vld [vmem:[#allocation2 + $0x60] sm:$0xff]  ;;  %v353_v60 = vld [vmem:[#allocation2 + $0x78] sm:$0xff] }
 0x100   : > { %v1290_v22 = vpack.c.bf16 %v892_v9, %v892_v9  ;;  %v906_v23 = vmax.f32 %v874_v10, 0.0  ;;  %v893_v24 = vmax.f32 %v861_v11, 0.0  ;;  %v875_v25 = vadd.f32 %v1581_v56, %v836_v12  ;;  %v693_v39 = vpop.f32.mrb[13].mxu1  ;;  %v1353_v40 = vpop.f32.mrb[14].mxu0  ;;  %v369_v62 = vld [vmem:[#allocation2 + $0xf8] sm:$0xff]  ;;  %v351_v3 = vld [vmem:[#allocation2 + $0x68] sm:$0xff] }
 0x101   : > { %v1306_v30 = vpack.c.bf16 %v908_v14, %v908_v14  ;;  %v1288_v32 = vpack.c.bf16 %v890_v15, %v890_v15  ;;  %v909_v33 = vmax.f32 %v877_v16, 0.0  ;;  %v891_v34 = vmax.f32 %v859_v17, 0.0  ;;  %v1369_v51 = vpop.f32.mrb[14].mxu1  ;;  %v632_v54 = vpop.f32.mrb[15].mxu0 }
 0x102   : > { %1053 = vst.msk [vmem:[%s1609_s8 + $0x18] sm:$0xf] %vm1046_vm2, %v1290_v22  ;;  %v1304_v41 = vpack.c.bf16 %v906_v23, %v906_v23  ;;  %v1291_v42 = vpack.c.bf16 %v893_v24, %v893_v24  ;;  %v907_v45 = vmax.f32 %v875_v25, 0.0  ;;  %v718_v47 = vadd.f32 %v1613_v31, %v348_v13  ;;  %v366_v31 = vld [vmem:[#allocation2 + $0xe0] sm:$0xff]  ;;  %v696_v63 = vpop.f32.mrb[15].mxu1 }
 0x103   : > { %1069 = vst.msk [vmem:[%s1609_s8 + $0x58] sm:$0xf] %vm1046_vm2, %v1306_v30  ;;  %1051 = vst.msk [vmem:[%s1609_s8 + $0x10] sm:$0xf] %vm1046_vm2, %v1288_v32  ;;  %v1307_v55 = vpack.c.bf16 %v909_v33, %v909_v33  ;;  %v1289_v57 = vpack.c.bf16 %v891_v34, %v891_v34  ;;  %v734_v58 = vadd.f32 %v1616_v36, %v364_v18 }
 0x104   : > { %v716_v59 = vadd.f32 %v1618_v37, %v346_v19  ;;  %1067 = vst.msk [vmem:[%s1609_s8 + $0x50] sm:$0xf] %vm1046_vm2, %v1304_v41  ;;  %1054 = vst.msk [vmem:[%s1609_s8 + $0x1c] sm:$0xf] %vm1046_vm2, %v1291_v42  ;;  %v1305_v0 = vpack.c.bf16 %v907_v45, %v907_v45  ;;  %v732_v1 = vadd.f32 %v1620_v43, %v362_v20  ;;  %v367_v37 = vld [vmem:[#allocation2 + $0xe8] sm:$0xff] }
 0x105   : > { %751 = vst.msk [vmem:[#allocation2 + $0x50] sm:$0xff] %vm305_vm0, %v718_v47  ;;  %v719_v2 = vadd.f32 %v1622_v44, %v349_v26  ;;  %v735_v36 = vadd.f32 %v1627_v52, %v365_v27  ;;  %767 = vst.msk [vmem:[#allocation2 + $0xd0] sm:$0xff] %vm305_vm0, %v734_v58  ;;  %v717_v4 = vadd.f32 %v1629_v53, %v347_v35 }
 0x106   : > { %1070 = vst.msk [vmem:[%s1609_s8 + $0x5c] sm:$0xf] %vm1046_vm2, %v1307_v55  ;;  %1052 = vst.msk [vmem:[%s1609_s8 + $0x14] sm:$0xf] %vm1046_vm2, %v1289_v57  ;;  %v733_v5 = vadd.f32 %v1637_v61, %v363_v38  ;;  %v722_v6 = vadd.f32 %v1352_v21, %v352_v48  ;;  %v738_v43 = vadd.f32 %v1368_v28, %v368_v49 }
 0x107   : > { %749 = vst.msk [vmem:[#allocation2 + $0x40] sm:$0xff] %vm305_vm0, %v716_v59  ;;  %765 = vst.msk [vmem:[#allocation2 + $0xc0] sm:$0xff] %vm305_vm0, %v732_v1  ;;  %v720_v44 = vadd.f32 %v629_v29, %v350_v50  ;;  %v736_v52 = vadd.f32 %v693_v39, %v366_v31  ;;  %v723_v7 = vadd.f32 %v1353_v40, %v353_v60 }
 0x108   : > { %1068 = vst.msk [vmem:[%s1609_s8 + $0x54] sm:$0xf] %vm1046_vm2, %v1305_v0  ;;  %v739_v8 = vadd.f32 %v1369_v51, %v369_v62  ;;  %v721_v53 = vadd.f32 %v632_v54, %v351_v3  ;;  %v737_v61 = vadd.f32 %v696_v63, %v367_v37 }
 0x109   : > { %752 = vst.msk [vmem:[#allocation2 + $0x58] sm:$0xff] %vm305_vm0, %v719_v2  ;;  %768 = vst.msk [vmem:[#allocation2 + $0xd8] sm:$0xff] %vm305_vm0, %v735_v36 }
 0x10a   : > { %750 = vst.msk [vmem:[#allocation2 + $0x48] sm:$0xff] %vm305_vm0, %v717_v4  ;;  %766 = vst.msk [vmem:[#allocation2 + $0xc8] sm:$0xff] %vm305_vm0, %v733_v5 }
 0x10b   : > { %755 = vst.msk [vmem:[#allocation2 + $0x70] sm:$0xff] %vm305_vm0, %v722_v6  ;;  %771 = vst.msk [vmem:[#allocation2 + $0xf0] sm:$0xff] %vm305_vm0, %v738_v43 }
 0x10c   : > { %753 = vst.msk [vmem:[#allocation2 + $0x60] sm:$0xff] %vm305_vm0, %v720_v44  ;;  %769 = vst.msk [vmem:[#allocation2 + $0xe0] sm:$0xff] %vm305_vm0, %v736_v52  ;;  %v786_v9 = vld [vmem:[#allocation2 + $0x50] sm:$0xff] }
 0x10d   : > { %756 = vst.msk [vmem:[#allocation2 + $0x78] sm:$0xff] %vm305_vm0, %v723_v7  ;;  %772 = vst.msk [vmem:[#allocation2 + $0xf8] sm:$0xff] %vm305_vm0, %v739_v8  ;;  %v825_v10 = vmul.f32 %v1576_v46, %v786_v9  ;;  %v802_v11 = vld [vmem:[#allocation2 + $0xd0] sm:$0xff] }
 0x10e   : > { %754 = vst.msk [vmem:[#allocation2 + $0x68] sm:$0xff] %vm305_vm0, %v721_v53  ;;  %770 = vst.msk [vmem:[#allocation2 + $0xe8] sm:$0xff] %vm305_vm0, %v737_v61  ;;  %v784_v12 = vld [vmem:[#allocation2 + $0x40] sm:$0xff]  ;;  %v841_v13 = vmul.f32 %v1576_v46, %v802_v11 }
 0x10f   : > { %v823_v14 = vmul.f32 %v1576_v46, %v784_v12  ;;  %v800_v15 = vld [vmem:[#allocation2 + $0xc0] sm:$0xff]  ;;  %v864_v18 = vadd.f32 %v1581_v56, %v825_v10 }
 0x110   : > { %v787_v16 = vld [vmem:[#allocation2 + $0x58] sm:$0xff]  ;;  %v839_v19 = vmul.f32 %v1576_v46, %v800_v15  ;;  %v880_v24 = vadd.f32 %v1581_v56, %v841_v13 }
 0x111   : > { %v803_v17 = vld [vmem:[#allocation2 + $0xd8] sm:$0xff]  ;;  %v826_v20 = vmul.f32 %v1576_v46, %v787_v16  ;;  %v785_v22 = vld [vmem:[#allocation2 + $0x48] sm:$0xff]  ;;  %v862_v25 = vadd.f32 %v1581_v56, %v823_v14  ;;  %v896_v28 = vmax.f32 %v864_v18, 0.0 }
 0x112   : > { %v842_v21 = vmul.f32 %v1576_v46, %v803_v17  ;;  %v801_v23 = vld [vmem:[#allocation2 + $0xc8] sm:$0xff]  ;;  %v824_v26 = vmul.f32 %v1576_v46, %v785_v22  ;;  %v878_v29 = vadd.f32 %v1581_v56, %v839_v19  ;;  %v912_v33 = vmax.f32 %v880_v24, 0.0  ;;  %v790_v39 = vld [vmem:[#allocation2 + $0x70] sm:$0xff] }
 0x113   : > { %v840_v27 = vmul.f32 %v1576_v46, %v801_v23  ;;  %v865_v30 = vadd.f32 %v1581_v56, %v826_v20  ;;  %v894_v34 = vmax.f32 %v862_v25, 0.0  ;;  %v1294_v40 = vpack.c.bf16 %v896_v28, %v896_v28  ;;  %v806_v47 = vld [vmem:[#allocation2 + $0xf0] sm:$0xff]  ;;  %v788_v48 = vld [vmem:[#allocation2 + $0x60] sm:$0xff] }
 0x114   : > { %v881_v32 = vadd.f32 %v1581_v56, %v842_v21  ;;  %v863_v35 = vadd.f32 %v1581_v56, %v824_v26  ;;  %v910_v41 = vmax.f32 %v878_v29, 0.0  ;;  %v1310_v49 = vpack.c.bf16 %v912_v33, %v912_v33  ;;  %v804_v55 = vld [vmem:[#allocation2 + $0xe0] sm:$0xff]  ;;  %v791_v57 = vld [vmem:[#allocation2 + $0x78] sm:$0xff] }
 0x115   : > { %v879_v38 = vadd.f32 %v1581_v56, %v840_v27  ;;  %v897_v42 = vmax.f32 %v865_v30, 0.0  ;;  %v1292_v50 = vpack.c.bf16 %v894_v34, %v894_v34  ;;  %v807_v58 = vld [vmem:[#allocation2 + $0xf8] sm:$0xff]  ;;  %1057 = vst.msk [vmem:[%s1609_s8 + $0x28] sm:$0xf] %vm1046_vm2, %v1294_v40  ;;  %v829_v62 = vmul.f32 %v1576_v46, %v790_v39  ;;  %v789_v63 = vld [vmem:[#allocation2 + $0x68] sm:$0xff] }
 0x116   : > { %v913_v45 = vmax.f32 %v881_v32, 0.0  ;;  %v895_v51 = vmax.f32 %v863_v35, 0.0  ;;  %v1308_v59 = vpack.c.bf16 %v910_v41, %v910_v41  ;;  %v805_v0 = vld [vmem:[#allocation2 + $0xe8] sm:$0xff]  ;;  %1073 = vst.msk [vmem:[%s1609_s8 + $0x68] sm:$0xf] %vm1046_vm2, %v1310_v49  ;;  %v845_v36 = vmul.f32 %v1576_v46, %v806_v47 }
 0x117   : > { %v911_v54 = vmax.f32 %v879_v38, 0.0  ;;  %v1295_v31 = vpack.c.bf16 %v897_v42, %v897_v42  ;;  %1055 = vst.msk [vmem:[%s1609_s8 + $0x20] sm:$0xf] %vm1046_vm2, %v1292_v50  ;;  %v827_v3 = vmul.f32 %v1576_v46, %v788_v48  ;;  %v868_v37 = vadd.f32 %v1581_v56, %v829_v62 }
 0x118   : > { %v1311_v60 = vpack.c.bf16 %v913_v45, %v913_v45  ;;  %v1293_v1 = vpack.c.bf16 %v895_v51, %v895_v51  ;;  %1071 = vst.msk [vmem:[%s1609_s8 + $0x60] sm:$0xf] %vm1046_vm2, %v1308_v59  ;;  %v843_v4 = vmul.f32 %v1576_v46, %v804_v55  ;;  %v830_v5 = vmul.f32 %v1576_v46, %v791_v57 }
 0x119   : > { %v1309_v2 = vpack.c.bf16 %v911_v54, %v911_v54  ;;  %1058 = vst.msk [vmem:[%s1609_s8 + $0x2c] sm:$0xf] %vm1046_vm2, %v1295_v31  ;;  %v846_v6 = vmul.f32 %v1576_v46, %v807_v58  ;;  %v884_v43 = vadd.f32 %v1581_v56, %v845_v36  ;;  %v866_v44 = vadd.f32 %v1581_v56, %v827_v3 }
 0x11a   : > { %1074 = vst.msk [vmem:[%s1609_s8 + $0x6c] sm:$0xf] %vm1046_vm2, %v1311_v60  ;;  %1056 = vst.msk [vmem:[%s1609_s8 + $0x24] sm:$0xf] %vm1046_vm2, %v1293_v1  ;;  %v828_v52 = vmul.f32 %v1576_v46, %v789_v63  ;;  %v844_v7 = vmul.f32 %v1576_v46, %v805_v0  ;;  %v900_v8 = vmax.f32 %v868_v37, 0.0  ;;  %v882_v53 = vadd.f32 %v1581_v56, %v843_v4 }
 0x11b   : > { %1072 = vst.msk [vmem:[%s1609_s8 + $0x64] sm:$0xf] %vm1046_vm2, %v1309_v2  ;;  %v869_v61 = vadd.f32 %v1581_v56, %v830_v5  ;;  %v885_v9 = vadd.f32 %v1581_v56, %v846_v6  ;;  %v916_v10 = vmax.f32 %v884_v43, 0.0  ;;  %v898_v11 = vmax.f32 %v866_v44, 0.0 }
 0x11c   : > { %v867_v12 = vadd.f32 %v1581_v56, %v828_v52  ;;  %v883_v13 = vadd.f32 %v1581_v56, %v844_v7  ;;  %v1298_v14 = vpack.c.bf16 %v900_v8, %v900_v8  ;;  %v914_v15 = vmax.f32 %v882_v53, 0.0 }
 0x11d   : > { %v901_v46 = vmax.f32 %v869_v61, 0.0  ;;  %v917_v16 = vmax.f32 %v885_v9, 0.0  ;;  %v1314_v17 = vpack.c.bf16 %v916_v10, %v916_v10  ;;  %v1296_v18 = vpack.c.bf16 %v898_v11, %v898_v11 }
 0x11e   : > { %v899_v19 = vmax.f32 %v867_v12, 0.0  ;;  %v915_v20 = vmax.f32 %v883_v13, 0.0  ;;  %1061 = vst.msk [vmem:[%s1609_s8 + $0x38] sm:$0xf] %vm1046_vm2, %v1298_v14  ;;  %v1312_v21 = vpack.c.bf16 %v914_v15, %v914_v15 }
 0x11f   : > { %v1299_v22 = vpack.c.bf16 %v901_v46, %v901_v46  ;;  %v1315_v23 = vpack.c.bf16 %v917_v16, %v917_v16  ;;  %1077 = vst.msk [vmem:[%s1609_s8 + $0x78] sm:$0xf] %vm1046_vm2, %v1314_v17  ;;  %1059 = vst.msk [vmem:[%s1609_s8 + $0x30] sm:$0xf] %vm1046_vm2, %v1296_v18 }
 0x120   : > { %v1297_v56 = vpack.c.bf16 %v899_v19, %v899_v19  ;;  %v1313_v24 = vpack.c.bf16 %v915_v20, %v915_v20  ;;  %1075 = vst.msk [vmem:[%s1609_s8 + $0x70] sm:$0xf] %vm1046_vm2, %v1312_v21 }
 0x121   : > { %1062 = vst.msk [vmem:[%s1609_s8 + $0x3c] sm:$0xf] %vm1046_vm2, %v1299_v22  ;;  %1078 = vst.msk [vmem:[%s1609_s8 + $0x7c] sm:$0xf] %vm1046_vm2, %v1315_v23 }
 0x122   : > { %1060 = vst.msk [vmem:[%s1609_s8 + $0x34] sm:$0xf] %vm1046_vm2, %v1297_v56  ;;  %1076 = vst.msk [vmem:[%s1609_s8 + $0x74] sm:$0xf] %vm1046_vm2, %v1313_v24 }
 0x123 PF: > { %s14_s17 = sadd.s32 1, %s1439_s17   ;;  %s1780_s15 = smov %s1435_s16 }
 0x124   : > { %p11_p5 = scmp.ge.s32.totalorder %s14_s17, 10   ;;  %s1781_s16 = smov %s1783_s18 }
 0x126   :  { %13 = sbr.rel (!%p11_p5) target bundleno = 2 (0x2), region = 83 }

</bundles_post_ra>
